<compile_context>
chip_gen: v6e
topology: v6e:2x2x1
jax: 0.10.0
libtpu: 0.0.40
codegen_flags: <defaults>
</compile_context>

<pallas_src>
import functools

import jax
import jax.numpy as jnp
import numpy as np
from jax.experimental import pallas as pl
from jax.experimental.pallas import tpu as pltpu


def _attention_kernel(x_ref, wqkv_ref, wo_ref, bout_ref, o_ref, *, heads, dim_head):
    # x_ref:    (Bb, N, Dp)        wqkv_ref: (Dp, 3*inner)   [Q cols pre-scaled]
    # wo_ref:   (inner, Dp)        bout_ref: (1, Dp)
    Bb, N, Dp = x_ref.shape
    inner = heads * dim_head
    cdtype = x_ref.dtype  # compute (operand) dtype, bf16 by default

    # Flatten the per-step batch into the MXU M dimension.
    xf = x_ref[...].reshape(Bb * N, Dp)

    # Single fused QKV projection: one wide MXU pass, f32 accumulation.
    qkv = jnp.dot(xf, wqkv_ref[...],
                  preferred_element_type=jnp.float32)          # (Bb*N, 3*inner)

    outs = []
    for h in range(heads):                                     # static unroll
        q = qkv[:, h * dim_head:(h + 1) * dim_head]
        k = qkv[:, inner + h * dim_head: inner + (h + 1) * dim_head]
        v = qkv[:, 2 * inner + h * dim_head: 2 * inner + (h + 1) * dim_head]
        q = q.astype(cdtype).reshape(Bb, N, dim_head)
        k = k.astype(cdtype).reshape(Bb, N, dim_head)
        v = v.astype(cdtype).reshape(Bb, N, dim_head)

        # Attention scores per batch element (scale already folded into Q).
        dots = jnp.einsum('bqd,bkd->bqk', q, k,
                          preferred_element_type=jnp.float32)  # (Bb, N, N)
        dots = dots - jnp.max(dots, axis=-1, keepdims=True)
        e = jnp.exp(dots)
        denom = jnp.sum(e, axis=-1, keepdims=True)             # (Bb, N, 1) >= 1

        # P@V with unnormalized (bf16) weights, then normalize the small
        # (N, dim_head) output using the EUP reciprocal.
        pv = jnp.einsum('bqk,bkd->bqd', e.astype(cdtype), v,
                        preferred_element_type=jnp.float32)    # (Bb, N, d)
        pv = pv * pl.reciprocal(denom, approx=True)
        outs.append(pv.reshape(Bb * N, dim_head))

    # Fused output projection: one MXU pass with contraction = inner.
    out = jnp.concatenate(outs, axis=-1).astype(cdtype)        # (Bb*N, inner)
    y = jnp.dot(out, wo_ref[...], preferred_element_type=jnp.float32)
    y = y + bout_ref[...].astype(jnp.float32)                  # (1, Dp) bias
    o_ref[...] = y.reshape(Bb, N, Dp).astype(o_ref.dtype)


def _choose_block_b(B, N, Dp, *, in_bytes=2, out_bytes=4,
                    block_budget_bytes=12 << 20):
    """Largest divisor of B whose double-buffered x/out blocks fit the VMEM
    budget (weights are grid-invariant).  Only shard into >= 2 grid steps
    (v7x has 2 TensorCores) when each step still keeps >= 256 MXU rows;
    prefer an even grid extent for balanced core shards."""
    divs = [d for d in range(1, B + 1) if B % d == 0]
    fits = [d for d in divs
            if 2 * d * N * Dp * (in_bytes + out_bytes) <= block_budget_bytes]
    if not fits:
        fits = [1]
    bb = max(fits)                       # default: one big step (no forced grid>=2)
    shard = [d for d in fits if d < bb and d * N >= 256]
    even = [d for d in shard if (B // d) % 2 == 0]
    if even:
        bb = max(even)
    elif shard:
        bb = max(shard)
    return bb


def attention_forward(x, w_qkv, w_out, b_out, *, heads, dim_head,
                      compute_dtype=jnp.bfloat16):
    """x: (B, N, D); w_qkv: (D, 3*heads*dim_head); w_out: (heads*dim_head, D); b_out: (D,)."""
    B, N, D = x.shape
    inner = heads * dim_head
    assert w_qkv.shape == (D, 3 * inner)
    assert w_out.shape == (inner, D)
    scale = float(dim_head) ** -0.5
    out_dtype = x.dtype

    # Fold the attention scale into the Q columns of the fused QKV weight.
    w_fused = jnp.concatenate([w_qkv[:, :inner] * scale, w_qkv[:, inner:]], axis=1)
    w_o = w_out
    b_o = b_out.reshape(1, D)

    # Lane-dense feature dim: zero-pad D to a multiple of 128 (transparent math).
    Dp = ((D + 127) // 128) * 128
    if Dp != D:
        pad = Dp - D
        x = jnp.pad(x, ((0, 0), (0, 0), (0, pad)))
        w_fused = jnp.pad(w_fused, ((0, pad), (0, 0)))
        w_o = jnp.pad(w_o, ((0, 0), (0, pad)))
        b_o = jnp.pad(b_o, ((0, 0), (0, pad)))

    # bf16 operands; accumulation stays f32 inside the kernel.
    x_c = x.astype(compute_dtype)
    w_fused = w_fused.astype(compute_dtype)
    w_o = w_o.astype(compute_dtype)
    b_o = b_o.astype(compute_dtype)

    Bb = _choose_block_b(B, N, Dp,
                         in_bytes=jnp.dtype(compute_dtype).itemsize,
                         out_bytes=jnp.dtype(out_dtype).itemsize)
    grid = (B // Bb,)

    kernel = functools.partial(_attention_kernel, heads=heads, dim_head=dim_head)

    out_p = pl.pallas_call(
        kernel,
        out_shape=jax.ShapeDtypeStruct((B, N, Dp), out_dtype),
        grid_spec=pltpu.PrefetchScalarGridSpec(
            num_scalar_prefetch=0,
            grid=grid,
            in_specs=[
                pl.BlockSpec((Bb, N, Dp), lambda b: (b, 0, 0)),
                pl.BlockSpec((Dp, 3 * inner), lambda b: (0, 0)),
                pl.BlockSpec((inner, Dp), lambda b: (0, 0)),
                pl.BlockSpec((1, Dp), lambda b: (0, 0)),
            ],
            out_specs=pl.BlockSpec((Bb, N, Dp), lambda b: (b, 0, 0)),
        ),
        compiler_params=pltpu.CompilerParams(
            dimension_semantics=("parallel",)),
    )(x_c, w_fused, w_o, b_o)

    return out_p[:, :, :D]


def attention_reference(x, w_qkv, w_out, b_out, *, heads, dim_head):
    """Pure-JAX f32 reference matching the PyTorch forward."""
    B, N, D = x.shape
    inner = heads * dim_head
    scale = dim_head ** -0.5
    qkv = jnp.einsum('bnd,de->bne', x, w_qkv)
    q, k, v = jnp.split(qkv, 3, axis=-1)
    reshape = lambda t: t.reshape(B, N, heads, dim_head).transpose(0, 2, 1, 3)
    q, k, v = map(reshape, (q, k, v))
    dots = jnp.einsum('bhid,bhjd->bhij', q, k) * scale
    attn = jax.nn.softmax(dots, axis=-1)
    out = jnp.einsum('bhij,bhjd->bhid', attn, v)
    out = out.transpose(0, 2, 1, 3).reshape(B, N, inner)
    return jnp.einsum('bni,id->bnd', out, w_out) + b_out


if __name__ == "__main__":
    # Small shapes consistent with the module's forward: x is (b, n, dim).
    B, N, DIM = 2, 8, 32
    HEADS, DIM_HEAD = 4, 16
    INNER = HEADS * DIM_HEAD

    key = jax.random.PRNGKey(0)
    kx, kq, ko, kb = jax.random.split(key, 4)

    x = jax.random.normal(kx, (B, N, DIM), dtype=jnp.float32)
    # nn.Linear weights stored here as (in, out); to_qkv has bias=False.
    w_qkv = jax.random.normal(kq, (DIM, 3 * INNER), dtype=jnp.float32) * 0.05
    w_out = jax.random.normal(ko, (INNER, DIM), dtype=jnp.float32) * 0.05
    b_out = jax.random.normal(kb, (DIM,), dtype=jnp.float32) * 0.05
    # Dropout(p) in eval mode -> identity (no-op).

    y = attention_forward(x, w_qkv, w_out, b_out, heads=HEADS, dim_head=DIM_HEAD)
    y = jax.block_until_ready(y)

    y_ref = attention_reference(x, w_qkv, w_out, b_out, heads=HEADS, dim_head=DIM_HEAD)
    # bf16 operands + approx reciprocal -> relaxed tolerance (f32 accumulation kept).
    np.testing.assert_allclose(np.asarray(y), np.asarray(y_ref), rtol=2e-2, atol=2e-2)

    print("KERNEL_OK")
</pallas_src>

<mosaic_0001>
module attributes {stable_mosaic.version = 11 : i64} {
  func.func @_attention_kernel(%arg0: i32, %arg1: memref<2x8x128xbf16, #tpu.memory_space<vmem>>, %arg2: memref<128x192xbf16, #tpu.memory_space<vmem>>, %arg3: memref<64x128xbf16, #tpu.memory_space<vmem>>, %arg4: memref<1x128xbf16, #tpu.memory_space<vmem>>, %arg5: memref<2x8x128xf32, #tpu.memory_space<vmem>>) attributes {dimension_semantics = [#tpu.dimension_semantics<parallel>], iteration_bounds = array<i64: 1>, scalar_prefetch = 0 : i64, scratch_operands = 0 : i64, tpu.core_type = #tpu.core_type<tc>, window_params = [{transform_indices = @transform_0, window_bounds = array<i64: 2, 8, 128>}, {pipeline_mode = #tpu.pipeline_mode<synchronous>, transform_indices = @transform_1, window_bounds = array<i64: 128, 192>}, {pipeline_mode = #tpu.pipeline_mode<synchronous>, transform_indices = @transform_2, window_bounds = array<i64: 64, 128>}, {pipeline_mode = #tpu.pipeline_mode<synchronous>, transform_indices = @transform_3, window_bounds = array<i64: 1, 128>}, {transform_indices = @transform_4, window_bounds = array<i64: 2, 8, 128>}]} {
    %c0 = arith.constant 0 : index
    %c0_0 = arith.constant 0 : index
    %c0_1 = arith.constant 0 : index
    %0 = vector.load %arg1[%c0, %c0_0, %c0_1] : memref<2x8x128xbf16, #tpu.memory_space<vmem>>, vector<2x8x128xbf16>
    %1 = vector.shape_cast %0 : vector<2x8x128xbf16> to vector<16x128xbf16>
    %c0_2 = arith.constant 0 : index
    %c0_3 = arith.constant 0 : index
    %2 = vector.load %arg2[%c0_2, %c0_3] : memref<128x192xbf16, #tpu.memory_space<vmem>>, vector<128x192xbf16>
    %cst = arith.constant dense<0.000000e+00> : vector<16x192xf32>
    %3 = tpu.matmul %1, %2, %cst {dimension_numbers = #tpu.dot_dimension_numbers<[1], [0], [0], [1], [0, 0, 1, 1], [], []>} : vector<16x128xbf16>, vector<128x192xbf16>, vector<16x192xf32> -> vector<16x192xf32>
    %4 = vector.extract_strided_slice %3 {offsets = [0, 0], sizes = [16, 16], strides = [1, 1]} : vector<16x192xf32> to vector<16x16xf32>
    %5 = vector.extract_strided_slice %3 {offsets = [0, 64], sizes = [16, 16], strides = [1, 1]} : vector<16x192xf32> to vector<16x16xf32>
    %6 = vector.extract_strided_slice %3 {offsets = [0, 128], sizes = [16, 16], strides = [1, 1]} : vector<16x192xf32> to vector<16x16xf32>
    %7 = arith.truncf %4 : vector<16x16xf32> to vector<16x16xbf16>
    %8 = vector.shape_cast %7 : vector<16x16xbf16> to vector<2x8x16xbf16>
    %9 = arith.truncf %5 : vector<16x16xf32> to vector<16x16xbf16>
    %10 = vector.shape_cast %9 : vector<16x16xbf16> to vector<2x8x16xbf16>
    %11 = arith.truncf %6 : vector<16x16xf32> to vector<16x16xbf16>
    %12 = vector.shape_cast %11 : vector<16x16xbf16> to vector<2x8x16xbf16>
    "tpu.trace_start"() <{level = 10 : i32, message = "bqd,bkd->bqk"}> : () -> ()
    %cst_4 = arith.constant dense<0.000000e+00> : vector<2x8x8xf32>
    %13 = tpu.matmul %8, %10, %cst_4 {dimension_numbers = #tpu.dot_dimension_numbers<[2], [2], [1], [1], [0, 0, 0, 1, 1, 1], [0], [0]>} : vector<2x8x16xbf16>, vector<2x8x16xbf16>, vector<2x8x8xf32> -> vector<2x8x8xf32>
    "tpu.trace_stop"() : () -> ()
    %cst_5 = arith.constant dense<0xFF800000> : vector<2x8xf32>
    %14 = vector.multi_reduction <maximumf>, %13, %cst_5 [2] : vector<2x8x8xf32> to vector<2x8xf32>
    %15 = vector.shape_cast %14 : vector<2x8xf32> to vector<2x8x1xf32>
    %16 = vector.broadcast %15 : vector<2x8x1xf32> to vector<2x8x8xf32>
    %17 = arith.subf %13, %16 : vector<2x8x8xf32>
    %18 = math.exp %17 : vector<2x8x8xf32>
    %cst_6 = arith.constant dense<0.000000e+00> : vector<2x8xf32>
    %19 = vector.multi_reduction <add>, %18, %cst_6 [2] : vector<2x8x8xf32> to vector<2x8xf32>
    %20 = vector.shape_cast %19 : vector<2x8xf32> to vector<2x8x1xf32>
    %21 = arith.truncf %18 : vector<2x8x8xf32> to vector<2x8x8xbf16>
    "tpu.trace_start"() <{level = 10 : i32, message = "bqk,bkd->bqd"}> : () -> ()
    %cst_7 = arith.constant dense<0.000000e+00> : vector<2x8x16xf32>
    %22 = tpu.matmul %21, %12, %cst_7 {dimension_numbers = #tpu.dot_dimension_numbers<[2], [1], [1], [2], [0, 0, 0, 1, 1, 2], [0], [0]>} : vector<2x8x8xbf16>, vector<2x8x16xbf16>, vector<2x8x16xf32> -> vector<2x8x16xf32>
    "tpu.trace_stop"() : () -> ()
    %23 = tpu.reciprocal %20 {approx = true} : vector<2x8x1xf32> -> vector<2x8x1xf32>
    %24 = vector.broadcast %23 : vector<2x8x1xf32> to vector<2x8x16xf32>
    %25 = arith.mulf %22, %24 : vector<2x8x16xf32>
    %26 = vector.shape_cast %25 : vector<2x8x16xf32> to vector<16x16xf32>
    %27 = vector.extract_strided_slice %3 {offsets = [0, 16], sizes = [16, 16], strides = [1, 1]} : vector<16x192xf32> to vector<16x16xf32>
    %28 = vector.extract_strided_slice %3 {offsets = [0, 80], sizes = [16, 16], strides = [1, 1]} : vector<16x192xf32> to vector<16x16xf32>
    %29 = vector.extract_strided_slice %3 {offsets = [0, 144], sizes = [16, 16], strides = [1, 1]} : vector<16x192xf32> to vector<16x16xf32>
    %30 = arith.truncf %27 : vector<16x16xf32> to vector<16x16xbf16>
    %31 = vector.shape_cast %30 : vector<16x16xbf16> to vector<2x8x16xbf16>
    %32 = arith.truncf %28 : vector<16x16xf32> to vector<16x16xbf16>
    %33 = vector.shape_cast %32 : vector<16x16xbf16> to vector<2x8x16xbf16>
    %34 = arith.truncf %29 : vector<16x16xf32> to vector<16x16xbf16>
    %35 = vector.shape_cast %34 : vector<16x16xbf16> to vector<2x8x16xbf16>
    "tpu.trace_start"() <{level = 10 : i32, message = "bqd,bkd->bqk"}> : () -> ()
    %cst_8 = arith.constant dense<0.000000e+00> : vector<2x8x8xf32>
    %36 = tpu.matmul %31, %33, %cst_8 {dimension_numbers = #tpu.dot_dimension_numbers<[2], [2], [1], [1], [0, 0, 0, 1, 1, 1], [0], [0]>} : vector<2x8x16xbf16>, vector<2x8x16xbf16>, vector<2x8x8xf32> -> vector<2x8x8xf32>
    "tpu.trace_stop"() : () -> ()
    %cst_9 = arith.constant dense<0xFF800000> : vector<2x8xf32>
    %37 = vector.multi_reduction <maximumf>, %36, %cst_9 [2] : vector<2x8x8xf32> to vector<2x8xf32>
    %38 = vector.shape_cast %37 : vector<2x8xf32> to vector<2x8x1xf32>
    %39 = vector.broadcast %38 : vector<2x8x1xf32> to vector<2x8x8xf32>
    %40 = arith.subf %36, %39 : vector<2x8x8xf32>
    %41 = math.exp %40 : vector<2x8x8xf32>
    %cst_10 = arith.constant dense<0.000000e+00> : vector<2x8xf32>
    %42 = vector.multi_reduction <add>, %41, %cst_10 [2] : vector<2x8x8xf32> to vector<2x8xf32>
    %43 = vector.shape_cast %42 : vector<2x8xf32> to vector<2x8x1xf32>
    %44 = arith.truncf %41 : vector<2x8x8xf32> to vector<2x8x8xbf16>
    "tpu.trace_start"() <{level = 10 : i32, message = "bqk,bkd->bqd"}> : () -> ()
    %cst_11 = arith.constant dense<0.000000e+00> : vector<2x8x16xf32>
    %45 = tpu.matmul %44, %35, %cst_11 {dimension_numbers = #tpu.dot_dimension_numbers<[2], [1], [1], [2], [0, 0, 0, 1, 1, 2], [0], [0]>} : vector<2x8x8xbf16>, vector<2x8x16xbf16>, vector<2x8x16xf32> -> vector<2x8x16xf32>
    "tpu.trace_stop"() : () -> ()
    %46 = tpu.reciprocal %43 {approx = true} : vector<2x8x1xf32> -> vector<2x8x1xf32>
    %47 = vector.broadcast %46 : vector<2x8x1xf32> to vector<2x8x16xf32>
    %48 = arith.mulf %45, %47 : vector<2x8x16xf32>
    %49 = vector.shape_cast %48 : vector<2x8x16xf32> to vector<16x16xf32>
    %50 = vector.extract_strided_slice %3 {offsets = [0, 32], sizes = [16, 16], strides = [1, 1]} : vector<16x192xf32> to vector<16x16xf32>
    %51 = vector.extract_strided_slice %3 {offsets = [0, 96], sizes = [16, 16], strides = [1, 1]} : vector<16x192xf32> to vector<16x16xf32>
    %52 = vector.extract_strided_slice %3 {offsets = [0, 160], sizes = [16, 16], strides = [1, 1]} : vector<16x192xf32> to vector<16x16xf32>
    %53 = arith.truncf %50 : vector<16x16xf32> to vector<16x16xbf16>
    %54 = vector.shape_cast %53 : vector<16x16xbf16> to vector<2x8x16xbf16>
    %55 = arith.truncf %51 : vector<16x16xf32> to vector<16x16xbf16>
    %56 = vector.shape_cast %55 : vector<16x16xbf16> to vector<2x8x16xbf16>
    %57 = arith.truncf %52 : vector<16x16xf32> to vector<16x16xbf16>
    %58 = vector.shape_cast %57 : vector<16x16xbf16> to vector<2x8x16xbf16>
    "tpu.trace_start"() <{level = 10 : i32, message = "bqd,bkd->bqk"}> : () -> ()
    %cst_12 = arith.constant dense<0.000000e+00> : vector<2x8x8xf32>
    %59 = tpu.matmul %54, %56, %cst_12 {dimension_numbers = #tpu.dot_dimension_numbers<[2], [2], [1], [1], [0, 0, 0, 1, 1, 1], [0], [0]>} : vector<2x8x16xbf16>, vector<2x8x16xbf16>, vector<2x8x8xf32> -> vector<2x8x8xf32>
    "tpu.trace_stop"() : () -> ()
    %cst_13 = arith.constant dense<0xFF800000> : vector<2x8xf32>
    %60 = vector.multi_reduction <maximumf>, %59, %cst_13 [2] : vector<2x8x8xf32> to vector<2x8xf32>
    %61 = vector.shape_cast %60 : vector<2x8xf32> to vector<2x8x1xf32>
    %62 = vector.broadcast %61 : vector<2x8x1xf32> to vector<2x8x8xf32>
    %63 = arith.subf %59, %62 : vector<2x8x8xf32>
    %64 = math.exp %63 : vector<2x8x8xf32>
    %cst_14 = arith.constant dense<0.000000e+00> : vector<2x8xf32>
    %65 = vector.multi_reduction <add>, %64, %cst_14 [2] : vector<2x8x8xf32> to vector<2x8xf32>
    %66 = vector.shape_cast %65 : vector<2x8xf32> to vector<2x8x1xf32>
    %67 = arith.truncf %64 : vector<2x8x8xf32> to vector<2x8x8xbf16>
    "tpu.trace_start"() <{level = 10 : i32, message = "bqk,bkd->bqd"}> : () -> ()
    %cst_15 = arith.constant dense<0.000000e+00> : vector<2x8x16xf32>
    %68 = tpu.matmul %67, %58, %cst_15 {dimension_numbers = #tpu.dot_dimension_numbers<[2], [1], [1], [2], [0, 0, 0, 1, 1, 2], [0], [0]>} : vector<2x8x8xbf16>, vector<2x8x16xbf16>, vector<2x8x16xf32> -> vector<2x8x16xf32>
    "tpu.trace_stop"() : () -> ()
    %69 = tpu.reciprocal %66 {approx = true} : vector<2x8x1xf32> -> vector<2x8x1xf32>
    %70 = vector.broadcast %69 : vector<2x8x1xf32> to vector<2x8x16xf32>
    %71 = arith.mulf %68, %70 : vector<2x8x16xf32>
    %72 = vector.shape_cast %71 : vector<2x8x16xf32> to vector<16x16xf32>
    %73 = vector.extract_strided_slice %3 {offsets = [0, 48], sizes = [16, 16], strides = [1, 1]} : vector<16x192xf32> to vector<16x16xf32>
    %74 = vector.extract_strided_slice %3 {offsets = [0, 112], sizes = [16, 16], strides = [1, 1]} : vector<16x192xf32> to vector<16x16xf32>
    %75 = vector.extract_strided_slice %3 {offsets = [0, 176], sizes = [16, 16], strides = [1, 1]} : vector<16x192xf32> to vector<16x16xf32>
    %76 = arith.truncf %73 : vector<16x16xf32> to vector<16x16xbf16>
    %77 = vector.shape_cast %76 : vector<16x16xbf16> to vector<2x8x16xbf16>
    %78 = arith.truncf %74 : vector<16x16xf32> to vector<16x16xbf16>
    %79 = vector.shape_cast %78 : vector<16x16xbf16> to vector<2x8x16xbf16>
    %80 = arith.truncf %75 : vector<16x16xf32> to vector<16x16xbf16>
    %81 = vector.shape_cast %80 : vector<16x16xbf16> to vector<2x8x16xbf16>
    "tpu.trace_start"() <{level = 10 : i32, message = "bqd,bkd->bqk"}> : () -> ()
    %cst_16 = arith.constant dense<0.000000e+00> : vector<2x8x8xf32>
    %82 = tpu.matmul %77, %79, %cst_16 {dimension_numbers = #tpu.dot_dimension_numbers<[2], [2], [1], [1], [0, 0, 0, 1, 1, 1], [0], [0]>} : vector<2x8x16xbf16>, vector<2x8x16xbf16>, vector<2x8x8xf32> -> vector<2x8x8xf32>
    "tpu.trace_stop"() : () -> ()
    %cst_17 = arith.constant dense<0xFF800000> : vector<2x8xf32>
    %83 = vector.multi_reduction <maximumf>, %82, %cst_17 [2] : vector<2x8x8xf32> to vector<2x8xf32>
    %84 = vector.shape_cast %83 : vector<2x8xf32> to vector<2x8x1xf32>
    %85 = vector.broadcast %84 : vector<2x8x1xf32> to vector<2x8x8xf32>
    %86 = arith.subf %82, %85 : vector<2x8x8xf32>
    %87 = math.exp %86 : vector<2x8x8xf32>
    %cst_18 = arith.constant dense<0.000000e+00> : vector<2x8xf32>
    %88 = vector.multi_reduction <add>, %87, %cst_18 [2] : vector<2x8x8xf32> to vector<2x8xf32>
    %89 = vector.shape_cast %88 : vector<2x8xf32> to vector<2x8x1xf32>
    %90 = arith.truncf %87 : vector<2x8x8xf32> to vector<2x8x8xbf16>
    "tpu.trace_start"() <{level = 10 : i32, message = "bqk,bkd->bqd"}> : () -> ()
    %cst_19 = arith.constant dense<0.000000e+00> : vector<2x8x16xf32>
    %91 = tpu.matmul %90, %81, %cst_19 {dimension_numbers = #tpu.dot_dimension_numbers<[2], [1], [1], [2], [0, 0, 0, 1, 1, 2], [0], [0]>} : vector<2x8x8xbf16>, vector<2x8x16xbf16>, vector<2x8x16xf32> -> vector<2x8x16xf32>
    "tpu.trace_stop"() : () -> ()
    %92 = tpu.reciprocal %89 {approx = true} : vector<2x8x1xf32> -> vector<2x8x1xf32>
    %93 = vector.broadcast %92 : vector<2x8x1xf32> to vector<2x8x16xf32>
    %94 = arith.mulf %91, %93 : vector<2x8x16xf32>
    %95 = vector.shape_cast %94 : vector<2x8x16xf32> to vector<16x16xf32>
    %96 = tpu.concatenate %26, %49, %72, %95 in 1 : vector<16x16xf32>, vector<16x16xf32>, vector<16x16xf32>, vector<16x16xf32> -> vector<16x64xf32>
    %97 = arith.truncf %96 : vector<16x64xf32> to vector<16x64xbf16>
    %c0_20 = arith.constant 0 : index
    %c0_21 = arith.constant 0 : index
    %98 = vector.load %arg3[%c0_20, %c0_21] : memref<64x128xbf16, #tpu.memory_space<vmem>>, vector<64x128xbf16>
    %cst_22 = arith.constant dense<0.000000e+00> : vector<16x128xf32>
    %99 = tpu.matmul %97, %98, %cst_22 {dimension_numbers = #tpu.dot_dimension_numbers<[1], [0], [0], [1], [0, 0, 1, 1], [], []>} : vector<16x64xbf16>, vector<64x128xbf16>, vector<16x128xf32> -> vector<16x128xf32>
    %c0_23 = arith.constant 0 : index
    %c0_24 = arith.constant 0 : index
    %100 = vector.load %arg4[%c0_23, %c0_24] : memref<1x128xbf16, #tpu.memory_space<vmem>>, vector<1x128xbf16>
    %101 = arith.extf %100 : vector<1x128xbf16> to vector<1x128xf32>
    %102 = vector.broadcast %101 : vector<1x128xf32> to vector<16x128xf32>
    %103 = arith.addf %99, %102 : vector<16x128xf32>
    %104 = vector.shape_cast %103 : vector<16x128xf32> to vector<2x8x128xf32>
    %c0_25 = arith.constant 0 : index
    %c0_26 = arith.constant 0 : index
    %c0_27 = arith.constant 0 : index
    %105 = vector.load %arg5[%c0_25, %c0_26, %c0_27] : memref<2x8x128xf32, #tpu.memory_space<vmem>>, vector<2x8x128xf32>
    tpu.vector_store %arg5[%c0_25, %c0_26, %c0_27], %104 {strides = array<i32>} : memref<2x8x128xf32, #tpu.memory_space<vmem>>, vector<2x8x128xf32>,
    return
  }
  func.func @transform_0(%arg0: i32) -> (i32, i32, i32) {
    %c0_i32 = arith.constant 0 : i32
    %c0_i32_0 = arith.constant 0 : i32
    %c0_i32_1 = arith.constant 0 : i32
    return %arg0, %c0_i32, %c0_i32_0 : i32, i32, i32
  }
  func.func @transform_1(%arg0: i32) -> (i32, i32) {
    %c0_i32 = arith.constant 0 : i32
    %c0_i32_0 = arith.constant 0 : i32
    %c0_i32_1 = arith.constant 0 : i32
    return %c0_i32, %c0_i32_0 : i32, i32
  }
  func.func @transform_2(%arg0: i32) -> (i32, i32) {
    %c0_i32 = arith.constant 0 : i32
    %c0_i32_0 = arith.constant 0 : i32
    %c0_i32_1 = arith.constant 0 : i32
    return %c0_i32, %c0_i32_0 : i32, i32
  }
  func.func @transform_3(%arg0: i32) -> (i32, i32) {
    %c0_i32 = arith.constant 0 : i32
    %c0_i32_0 = arith.constant 0 : i32
    %c0_i32_1 = arith.constant 0 : i32
    return %c0_i32, %c0_i32_0 : i32, i32
  }
  func.func @transform_4(%arg0: i32) -> (i32, i32, i32) {
    %c0_i32 = arith.constant 0 : i32
    %c0_i32_0 = arith.constant 0 : i32
    %c0_i32_1 = arith.constant 0 : i32
    return %arg0, %c0_i32, %c0_i32_0 : i32, i32, i32
  }
}

</mosaic_0001>

<bundles_post_ra>
// kernel: tpu_custom_call.1
= control target key start
LH: loop header
LB: loop body
LE: loop exit
PB: predicated region body
PF: predicated region fallthrough
CT: control target
= control target key end

     0   :  { %v1489_v2 = vmov 0   ;;  %s1791_s0 = inlined_call_operand.vmem [shape: bf16[2,8,128], index: 0, kind: input, shape index: {}]   ;;  %s1792_s1 = inlined_call_operand.vmem [shape: bf16[128,192], index: 1, kind: input, shape index: {}]   ;;  %s1793_s2 = inlined_call_operand.vmem [shape: bf16[64,128], index: 2, kind: input, shape index: {}]   ;;  %s1794_s3 = inlined_call_operand.vmem [shape: bf16[1,128], index: 3, kind: input, shape index: {}]   ;;  %s1795_s4 = inlined_call_operand.hbm [shape: f32[2,8,128], index: 4, kind: output, shape index: {}]  }
   0x1   :  { %v1406_v0 = vld [vmem:[%s1792_s1 + $0x74] ss:$8 sps:$4 sm:$0xff]   ;;  %v1408_v1 = vld [vmem:[%s1792_s1 + $0x70] ss:$8 sps:$4 sm:$0xff]   ;;  %155 = vmatprep.mubr.bf16.mxu0 %v1489_v2  ;;  %v1409_v3 = vld [vmem:[%s1792_s1 + $0x64] ss:$8 sps:$4 sm:$0xff]  }
   0x2   :  { %123 = vmatprep.subr.bf16.mxu0 %v1406_v0  ;;  %v1411_v4 = vld [vmem:[%s1792_s1 + $0x60] ss:$8 sps:$4 sm:$0xff]   ;;  %v1412_v5 = vld [vmem:[%s1792_s1 + $0x54] ss:$8 sps:$4 sm:$0xff]   ;;  %v1414_v6 = vld [vmem:[%s1792_s1 + $0x50] ss:$8 sps:$4 sm:$0xff]  }
   0x3   :  { %124 = vmatpush1.bf16.msra.mxu0 %v1408_v1  ;;  %v1415_v7 = vld [vmem:[%s1792_s1 + $0x44] ss:$8 sps:$4 sm:$0xff]   ;;  %v1417_v8 = vld [vmem:[%s1792_s1 + $0x40] ss:$8 sps:$4 sm:$0xff]   ;;  %v1418_v9 = vld [vmem:[%s1792_s1 + $0x34] ss:$8 sps:$4 sm:$0xff]  }
   0x4   :  { %125 = vmatprep.subr.bf16.mxu0 %v1409_v3 }
   0x7   :  { %126 = vmatpush1.bf16.msra.mxu0 %v1411_v4 }
   0x8   :  { %127 = vmatprep.subr.bf16.mxu0 %v1412_v5 }
   0xb   :  { %128 = vmatpush1.bf16.msra.mxu0 %v1414_v6 }
   0xc   :  { %129 = vmatprep.subr.bf16.mxu0 %v1415_v7 }
   0xd   :  { %9 = vsyncpa [#allocation3], 0  ;;  %v1420_v10 = vld [vmem:[%s1792_s1 + $0x30] ss:$8 sps:$4 sm:$0xff]   ;;  %v1421_v11 = vld [vmem:[%s1792_s1 + $0x24] ss:$8 sps:$4 sm:$0xff]  }
   0xe   :  { %v1423_v12 = vld [vmem:[%s1792_s1 + $0x20] ss:$8 sps:$4 sm:$0xff]   ;;  %v1424_v13 = vld [vmem:[%s1792_s1 + $0x14] ss:$8 sps:$4 sm:$0xff]   ;;  %v1426_v14 = vld [vmem:[%s1792_s1 + $0x10] ss:$8 sps:$4 sm:$0xff]  }
   0xf   :  { %130 = vmatpush1.bf16.msra.mxu0 %v1417_v8  ;;  %v1427_v15 = vld [vmem:[%s1792_s1 + $0x4] ss:$8 sps:$4 sm:$0xff]   ;;  %v1429_v16 = vld [vmem:[%s1792_s1] ss:$8 sps:$4 sm:$0xff]   ;;  %v1490_v18 = vmov 0.0   ;;  %vm1491_vm0 = vmmov 0  }
  0x10   :  { %131 = vmatprep.subr.bf16.mxu0 %v1418_v9  ;;  %v1430_v17 = vld [vmem:[%s1791_s0] sm:$0xff]   ;;  %1270 = vmatprep.subr.bf16.mxu1 %v1490_v18  ;;  %s1492_s1 = smov 64   ;;  %s1493_s0 = smov 48   ;;  %vm180_vm1 = vcmask 130048   ;;  %vm299_vm2 = vcmask 1043456   ;;  %vm275_vm3 = vcmask 64512  }
  0x11   :  { %1272 = vmatprep.mubr.msk.bf16.mxu1 %vm1491_vm0, %v1490_v18  ;;  %s1494_s23 = smov 112   ;;  %s1495_s24 = smov 32   ;;  %vm1079_vm4 = vcmask 261120   ;;  %vm1082_vm5 = vcmask 392192   ;;  %vm1124_vm6 = vcmask 523264  }
  0x12   :  { %s1496_s25 = smov 96   ;;  %s1497_s26 = smov 16  }
  0x13   :  { %132 = vmatpush1.bf16.msra.mxu0 %v1420_v10  ;;  %s1498_s27 = smov 80   ;;  %s1499_s11 = smov [#allocation2]  }
  0x14   :  { %133 = vmatprep.subr.bf16.mxu0 %v1421_v11  ;;  %s1176_s12 = sshll.u32 %s1499_s11, 4  ;;  %s1177_s12 = int_to_ptr.vmem [resolvable:$true] %s1176_s12 }
  0x15   :  { %s1467_s13 = scalar_lea.vmem %s1177_s12, 256  ;;  %p1472_p1 = scmp.lt.s32.totalorder %s1177_s12, %s1177_s12 }
  0x16   :  { %p1468_p0 = scmp.ne.s32.totalorder %s1177_s12, %s1467_s13  ;;  %p1473_p2 = scmp.lt.s32.totalorder %s1467_s13, %s1467_s13 }
  0x17   :  { %134 = vmatpush1.bf16.msra.mxu0 %v1423_v12 }
  0x18   :  { %135 = vmatprep.subr.bf16.mxu0 %v1424_v13  ;;  %p1474_p3 = por %p1473_p2, %p1472_p1 }
  0x1a   :  { %p1475_p4 = pnand %p1474_p3, %p1468_p0 }
  0x1b   :  { %136 = vmatpush1.bf16.msra.mxu0 %v1426_v14 }
  0x1c   :  { %137 = vmatprep.subr.bf16.mxu0 %v1427_v15 }
  0x1f   :  { %138 = vmatpush1.bf16.msra.mxu0 %v1429_v16 }
  0x20   :  { %1306 = vmatprep.subr.bf16.mxu0 %v1490_v18 }
  0x22   :  { %156 = vmatmul.mubr.bf16.vlgmr.msra.gmra.mxu0 %v1430_v17 }
  0x23   :  { %1308 = vmatprep.mubr.msk.bf16.mxu0 %vm1491_vm0, %v1490_v18 }
  0xe2   :  { %v157_v19 = vpop.f32.mrf.mxu0 }
  0xe3   :  { %v1584_v20 = vpack.c.bf16 %v157_v19, %v157_v19 }
  0xe4   :  { %v159_v21 = vpop.f32.mrf.mxu0 }
  0xe5   :  { %178 = vrot.lane.b32.xlu0 %v1584_v20, %s1492_s1  ;;  %v1596_v24 = vpack.c.bf16 %v159_v21, %v159_v21 }
  0xe6   :  { %v161_v22 = vpop.f32.mrf.mxu0 }
  0xe7   :  { %v1587_v23 = vpack.c.bf16 %v161_v22, %v161_v22  ;;  %v301_v32 = vsel %vm299_vm2, %v1596_v24, 0 }
  0xe8   :  { %v163_v51 = vpop.f32.mrf.mxu0 }
  0xe9   :  { %227 = vrot.lane.b32.xlu0 %v1587_v23, %s1492_s1  ;;  %v1621_v52 = vpack.c.bf16 %v163_v51, %v163_v51 }
  0xeb   :  { %v347_v55 = vsel %vm299_vm2, %v1621_v52, 0 }
  0xed   :  { %395 = vrot.lane.b32.xlu0 %v1584_v20, %s1493_s0 }
  0xf1   :  { %445 = vrot.lane.b32.xlu0 %v1587_v23, %s1493_s0 }
  0xf5   :  { %443 = vrot.lane.b32.xlu0 %v1587_v23, %s1494_s23 }
  0xf9   :  { %513 = vrot.lane.b32.xlu0 %v1596_v24, %s1494_s23 }
 0x157   :  { %v179_v25 = vpop.permute.xlu0 %178 }
 0x158   :  { %v185_v26 = vsel %vm180_vm1, %v179_v25, 0 }
 0x159   :  { %1271 = vmatpush3.bf16.xpose.msra.mxu1 %v185_v26 }
 0x15a   :  { %1276 = vmatprep.subr.bf16.mxu1 %v1490_v18 }
 0x15b   :  { %v228_v27 = vpop.permute.xlu0 %227 }
 0x15c   :  { %v233_v29 = vsel %vm180_vm1, %v228_v27, 0 }
 0x15f   :  { %v396_v28 = vpop.permute.xlu0 %395 }
 0x160   :  { %1273 = vmatmul.mubr.msk.bf16.vlgmr.msra.gmra.mxu1 %vm180_vm1, %v1584_v20  ;;  %v401_v58 = vsel %vm180_vm1, %v396_v28, 0 }
 0x161   :  { %1277 = vmatpush3.bf16.xpose.msra.mxu1 %v233_v29  ;;  %1278 = vmatprep.mubr.msk.bf16.mxu1 %vm1491_vm0, %v1490_v18 }
 0x162   :  { %1282 = vmatprep.subr.bf16.mxu1 %v1490_v18 }
 0x163   :  { %v446_v30 = vpop.permute.xlu0 %445 }
 0x164   :  { %v451_v60 = vsel %vm180_vm1, %v446_v30, 0 }
 0x167   :  { %v444_v31 = vpop.permute.xlu0 %443 }
 0x168   :  { %1279 = vmatmul.mubr.msk.bf16.vlgmr.msra.gmra.mxu1 %vm180_vm1, %v1587_v23 }
 0x169   :  { %1283 = vmatpush3.bf16.msra.mxu1 %v301_v32  ;;  %1284 = vmatprep.mubr.msk.bf16.mxu1 %vm1491_vm0, %v1490_v18 }
 0x16a   :  { %1288 = vmatprep.subr.bf16.mxu1 %v1490_v18 }
 0x16b   :  { %v514_v33 = vpop.permute.xlu0 %513 }
 0x16c   :  { %v519_v34 = vsel %vm299_vm2, %v514_v33, 0 }
 0x16d   :  { %1307 = vmatpush3.bf16.msra.mxu0 %v519_v34 }
 0x16e   :  { %1318 = vmatprep.subr.bf16.mxu0 %v1490_v18 }
 0x220   :  { %v221_v35 = vpop.f32.mrf.mxu1 }
 0x221   :  { %v276_v36 = vsel %vm275_vm3, %v221_v35, -inf }
 0x222   :  { %277 = vmax.xlane.f32.xlu1 %v276_v36  ;;  %v1274_v37 = vpop.f32.mrf.mxu1 }
 0x224   :  { %v224_v38 = vpop.f32.mrf.mxu1 }
 0x226   :  { %v1275_v39 = vpop.f32.mrf.mxu1 }
 0x228   :  { %v269_v40 = vpop.f32.mrf.mxu1 }
 0x229   :  { %v279_v41 = vsel %vm275_vm3, %v269_v40, -inf }
 0x22a   :  { %280 = vmax.xlane.f32.xlu1 %v279_v41  ;;  %v1280_v42 = vpop.f32.mrf.mxu1 }
 0x22c   :  { %v272_v43 = vpop.f32.mrf.mxu1 }
 0x22e   :  { %v1281_v44 = vpop.f32.mrf.mxu1 }
 0x23b   :  { %393 = vrot.lane.b32.xlu1 %v1584_v20, %s1494_s23 }
 0x2ab   :  { %v278_v45 = vpop.xlane.xlu1 %277 }
 0x2ac   :  { %v282_v46 = vsub.f32 %v221_v35, %v278_v45 }
 0x2ae   :  { %v284_v47 = vmul.f32 1.442695, %v282_v46 }
 0x2b0   :  { %1435 = vpow2.f32 %v284_v47 }
 0x2b3   :  { %v281_v48 = vpop.xlane.xlu1 %280 }
 0x2b4   :  { %v283_v49 = vsub.f32 %v269_v40, %v281_v48 }
 0x2b6   :  { %v286_v50 = vmul.f32 1.442695, %v283_v49 }
 0x2b7   :  { %v394_v59 = vpop.permute.xlu1 %393 }
 0x2b8   :  { %1437 = vpow2.f32 %v286_v50 }
 0x2bd   :  { %v1623_v53 = vpop.eup %1435 }
 0x2be   :  { %v294_v54 = vpack.c.bf16 %v1623_v53, %v1623_v53 }
 0x2c0   :  { %1285 = vmatmul.mubr.msk.bf16.vlgmr.msra.gmra.mxu1 %vm275_vm3, %v294_v54 }
 0x2c1   :  { %1289 = vmatpush3.bf16.msra.mxu1 %v347_v55  ;;  %1290 = vmatprep.mubr.msk.bf16.mxu1 %vm1491_vm0, %v1490_v18 }
 0x2c2   :  { %1294 = vmatprep.subr.bf16.mxu1 %v1490_v18 }
 0x2c5   :  { %v1633_v56 = vpop.eup %1437 }
 0x2c6   :  { %v295_v57 = vpack.c.bf16 %v1633_v56, %v1633_v56 }
 0x2c8   :  { %1291 = vmatmul.mubr.msk.bf16.vlgmr.msra.gmra.mxu1 %vm275_vm3, %v295_v57 }
 0x2c9   :  { %1295 = vmatpush3.bf16.xpose.msra.mxu1 %v401_v58  ;;  %1296 = vmatprep.mubr.msk.bf16.mxu1 %vm1491_vm0, %v1490_v18 }
 0x2ca   :  { %1300 = vmatprep.subr.bf16.mxu1 %v1490_v18 }
 0x2d0   :  { %1297 = vmatmul.mubr.msk.bf16.vlgmr.msra.gmra.mxu1 %vm180_vm1, %v394_v59 }
 0x2d1   :  { %1301 = vmatpush3.bf16.xpose.msra.mxu1 %v451_v60  ;;  %1302 = vmatprep.mubr.msk.bf16.mxu1 %vm1491_vm0, %v1490_v18 }
 0x2d2   :  { %1312 = vmatprep.subr.bf16.mxu1 %v1490_v18 }
 0x2d8   :  { %1303 = vmatmul.mubr.msk.bf16.vlgmr.msra.gmra.mxu1 %vm180_vm1, %v444_v31 }
 0x2d9   :  { %1314 = vmatprep.mubr.msk.bf16.mxu1 %vm1491_vm0, %v1490_v18 }
 0x380   :  { %v1650_v61 = vpop.f32.mrf.mxu1 }
 0x382   :  { %v1286_v62 = vpop.f32.mrf.mxu1 }
 0x384   :  { %v340_v63 = vpop.f32.mrf.mxu1 }
 0x386   :  { %v1287_v0 = vpop.f32.mrf.mxu1 }
 0x388   :  { %v1652_v1 = vpop.f32.mrf.mxu1 }
 0x38a   :  { %v1292_v2 = vpop.f32.mrf.mxu1 }
 0x38c   :  { %v386_v3 = vpop.f32.mrf.mxu1 }
 0x38e   :  { %v1293_v4 = vpop.f32.mrf.mxu1 }
 0x390   :  { %v437_v5 = vpop.f32.mrf.mxu1 }
 0x391   :  { %v493_v6 = vsel %vm275_vm3, %v437_v5, -inf }
 0x392   :  { %494 = vmax.xlane.f32.xlu0 %v493_v6  ;;  %v1298_v7 = vpop.f32.mrf.mxu1 }
 0x394   :  { %v440_v8 = vpop.f32.mrf.mxu1 }
 0x396   :  { %v1299_v9 = vpop.f32.mrf.mxu1 }
 0x398   :  { %v487_v10 = vpop.f32.mrf.mxu1 }
 0x399   :  { %v496_v11 = vsel %vm275_vm3, %v487_v10, -inf }
 0x39a   :  { %497 = vmax.xlane.f32.xlu1 %v496_v11  ;;  %v1304_v12 = vpop.f32.mrf.mxu1 }
 0x39c   :  { %v490_v13 = vpop.f32.mrf.mxu1 }
 0x39e   :  { %v1305_v14 = vpop.f32.mrf.mxu1 }
 0x3a8   :  { %615 = vrot.lane.b32.xlu0 %v1584_v20, %s1495_s24 }
 0x3ab   :  { %561 = vrot.lane.b32.xlu1 %v1621_v52, %s1494_s23 }
 0x3ac   :  { %665 = vrot.lane.b32.xlu0 %v1587_v23, %s1495_s24 }
 0x3af   :  { %613 = vrot.lane.b32.xlu1 %v1584_v20, %s1496_s25 }
 0x3b0   :  { %663 = vrot.lane.b32.xlu0 %v1587_v23, %s1496_s25 }
 0x41b   :  { %v495_v15 = vpop.xlane.xlu0 %494 }
 0x41c   :  { %v499_v16 = vsub.f32 %v437_v5, %v495_v15 }
 0x41e   :  { %v501_v17 = vmul.f32 1.442695, %v499_v16 }
 0x41f   :  { %v616_v28 = vpop.permute.xlu0 %615 }
 0x420   :  { %1439 = vpow2.f32 %v501_v17  ;;  %v621_v30 = vsel %vm180_vm1, %v616_v28, 0 }
 0x423   :  { %v498_v19 = vpop.xlane.xlu1 %497  ;;  %v666_v32 = vpop.permute.xlu0 %665 }
 0x424   :  { %v500_v21 = vsub.f32 %v487_v10, %v498_v19  ;;  %v671_v35 = vsel %vm180_vm1, %v666_v32, 0 }
 0x426   :  { %v503_v22 = vmul.f32 1.442695, %v500_v21 }
 0x427   :  { %v562_v25 = vpop.permute.xlu1 %561  ;;  %v664_v36 = vpop.permute.xlu0 %663 }
 0x428   :  { %1441 = vpow2.f32 %v503_v22  ;;  %v567_v26 = vsel %vm299_vm2, %v562_v25, 0 }
 0x429   :  { %1313 = vmatpush3.bf16.msra.mxu1 %v567_v26 }
 0x42a   :  { %1324 = vmatprep.subr.bf16.mxu1 %v1490_v18 }
 0x42b   :  { %v614_v34 = vpop.permute.xlu1 %613 }
 0x42d   :  { %v1668_v27 = vpop.eup %1439 }
 0x42e   :  { %v511_v29 = vpack.c.bf16 %v1668_v27, %v1668_v27 }
 0x430   :  { %1309 = vmatmul.mubr.msk.bf16.vlgmr.msra.gmra.mxu0 %vm275_vm3, %v511_v29 }
 0x431   :  { %1319 = vmatpush3.bf16.xpose.msra.mxu0 %v621_v30  ;;  %1320 = vmatprep.mubr.msk.bf16.mxu0 %vm1491_vm0, %v1490_v18 }
 0x432   :  { %1330 = vmatprep.subr.bf16.mxu0 %v1490_v18 }
 0x435   :  { %v1677_v31 = vpop.eup %1441 }
 0x436   :  { %v512_v33 = vpack.c.bf16 %v1677_v31, %v1677_v31 }
 0x438   :  { %1315 = vmatmul.mubr.msk.bf16.vlgmr.msra.gmra.mxu1 %vm275_vm3, %v512_v33  ;;  %1321 = vmatmul.mubr.msk.bf16.vlgmr.msra.gmra.mxu0 %vm180_vm1, %v614_v34 }
 0x439   :  { %1325 = vmatpush3.bf16.xpose.msra.mxu1 %v671_v35  ;;  %1326 = vmatprep.mubr.msk.bf16.mxu1 %vm1491_vm0, %v1490_v18 }
 0x43a   :  { %1336 = vmatprep.subr.bf16.mxu1 %v1490_v18  ;;  %1332 = vmatprep.mubr.msk.bf16.mxu0 %vm1491_vm0, %v1490_v18 }
 0x440   :  { %1327 = vmatmul.mubr.msk.bf16.vlgmr.msra.gmra.mxu1 %vm180_vm1, %v664_v36 }
 0x441   :  { %1338 = vmatprep.mubr.msk.bf16.mxu1 %vm1491_vm0, %v1490_v18 }
 0x4f0   :  { %v1692_v37 = vpop.f32.mrf.mxu0 }
 0x4f2   :  { %v1310_v38 = vpop.f32.mrf.mxu0 }
 0x4f4   :  { %v558_v39 = vpop.f32.mrf.mxu0 }
 0x4f5   :  { %v505_v39 = vsel %vm275_vm3, %v1668_v27, 0.0 }
 0x4f6   :  { %v1311_v40 = vpop.f32.mrf.mxu0 }
 0x4f8   :  { %v1694_v41 = vpop.f32.mrf.mxu1  ;;  %v657_v42 = vpop.f32.mrf.mxu0 }
 0x4f9   :  { %v713_v43 = vsel %vm275_vm3, %v657_v42, -inf }
 0x4fa   :  { %714 = vmax.xlane.f32.xlu1 %v713_v43  ;;  %v1316_v44 = vpop.f32.mrf.mxu1  ;;  %v1322_v45 = vpop.f32.mrf.mxu0 }
 0x4fc   :  { %v606_v46 = vpop.f32.mrf.mxu1  ;;  %v660_v47 = vpop.f32.mrf.mxu0 }
 0x4fe   :  { %v1317_v48 = vpop.f32.mrf.mxu1  ;;  %v1323_v49 = vpop.f32.mrf.mxu0 }
 0x500   :  { %v707_v50 = vpop.f32.mrf.mxu1 }
 0x501   :  { %v716_v51 = vsel %vm275_vm3, %v707_v50, -inf }
 0x502   :  { %717 = vmax.xlane.f32.xlu0 %v716_v51  ;;  %v1328_v54 = vpop.f32.mrf.mxu1 }
 0x504   :  { %v710_v55 = vpop.f32.mrf.mxu1 }
 0x505   :  { %v288_v55 = vsel %vm275_vm3, %v1623_v53, 0.0 }
 0x506   :  { %v1329_v57 = vpop.f32.mrf.mxu1 }
 0x50b   :  { %781 = vrot.lane.b32.xlu1 %v1621_v52, %s1496_s25 }
 0x50f   :  { %835 = vrot.lane.b32.xlu1 %v1584_v20, %s1497_s26 }
 0x513   :  { %833 = vrot.lane.b32.xlu1 %v1584_v20, %s1498_s27 }
 0x518   :  { %733 = vrot.lane.b32.xlu0 %v1596_v24, %s1496_s25 }
 0x51c   :  { %885 = vrot.lane.b32.xlu0 %v1587_v23, %s1497_s26 }
 0x520   :  { %883 = vrot.lane.b32.xlu0 %v1587_v23, %s1498_s27 }
 0x583   :  { %v715_v58 = vpop.xlane.xlu1 %714 }
 0x584   :  { %v719_v59 = vsub.f32 %v657_v42, %v715_v58  ;;  %v508_v42 = vsel %vm275_vm3, %v1677_v31, 0.0 }
 0x586   :  { %v721_v60 = vmul.f32 1.442695, %v719_v59 }
 0x587   :  { %v782_v62 = vpop.permute.xlu1 %781 }
 0x588   :  { %1443 = vpow2.f32 %v721_v60  ;;  %v787_v63 = vsel %vm299_vm2, %v782_v62, 0  ;;  %v291_v60 = vsel %vm275_vm3, %v1633_v56, 0.0 }
 0x589   :  { %1337 = vmatpush3.bf16.msra.mxu1 %v787_v63 }
 0x58a   :  { %1348 = vmatprep.subr.bf16.mxu1 %v1490_v18 }
 0x58b   :  { %v718_v20 = vpop.xlane.xlu0 %717  ;;  %v836_v5 = vpop.permute.xlu1 %835 }
 0x58c   :  { %v720_v0 = vsub.f32 %v707_v50, %v718_v20  ;;  %v841_v7 = vsel %vm180_vm1, %v836_v5, 0 }
 0x58e   :  { %v723_v2 = vmul.f32 1.442695, %v720_v0 }
 0x58f   :  { %v734_v3 = vpop.permute.xlu0 %733  ;;  %v834_v11 = vpop.permute.xlu1 %833 }
 0x590   :  { %1445 = vpow2.f32 %v723_v2  ;;  %v739_v4 = vsel %vm299_vm2, %v734_v3, 0 }
 0x591   :  { %1331 = vmatpush3.bf16.msra.mxu0 %v739_v4 }
 0x592   :  { %1342 = vmatprep.subr.bf16.mxu0 %v1490_v18 }
 0x593   :  { %v886_v9 = vpop.permute.xlu0 %885 }
 0x594   :  { %v891_v12 = vsel %vm180_vm1, %v886_v9, 0  ;;  %v1431_v9 = vld [vmem:[%s1793_s2 + $0x18] sm:$0xff]  }
 0x595   :  { %v1444_v23 = vpop.eup %1443 }
 0x596   :  { %v731_v6 = vpack.c.bf16 %v1444_v23, %v1444_v23  ;;  %v725_v43 = vsel %vm275_vm3, %v1444_v23, 0.0 }
 0x597   :  { %v884_v13 = vpop.permute.xlu0 %883 }
 0x598   :  { %1333 = vmatmul.mubr.msk.bf16.vlgmr.msra.gmra.mxu0 %vm275_vm3, %v731_v6 }
 0x599   :  { %1343 = vmatpush3.bf16.xpose.msra.mxu0 %v841_v7  ;;  %1344 = vmatprep.mubr.msk.bf16.mxu0 %vm1491_vm0, %v1490_v18 }
 0x59a   :  { %1354 = vmatprep.subr.bf16.mxu0 %v1490_v18 }
 0x59d   :  { %v1446_v8 = vpop.eup %1445 }
 0x59e   :  { %v732_v10 = vpack.c.bf16 %v1446_v8, %v1446_v8  ;;  %v728_v40 = vsel %vm275_vm3, %v1446_v8, 0.0 }
 0x5a0   :  { %1339 = vmatmul.mubr.msk.bf16.vlgmr.msra.gmra.mxu1 %vm275_vm3, %v732_v10  ;;  %1345 = vmatmul.mubr.msk.bf16.vlgmr.msra.gmra.mxu0 %vm180_vm1, %v834_v11 }
 0x5a1   :  { %1349 = vmatpush3.bf16.xpose.msra.mxu1 %v891_v12  ;;  %1350 = vmatprep.mubr.msk.bf16.mxu1 %vm1491_vm0, %v1490_v18 }
 0x5a2   :  { %1360 = vmatprep.subr.bf16.mxu1 %v1490_v18  ;;  %1356 = vmatprep.mubr.msk.bf16.mxu0 %vm1491_vm0, %v1490_v18 }
 0x5a8   :  { %1351 = vmatmul.mubr.msk.bf16.vlgmr.msra.gmra.mxu1 %vm180_vm1, %v884_v13  ;;  %v1434_v13 = vld [vmem:[%s1793_s2] sm:$0xff]  }
 0x5a9   :  { %1362 = vmatprep.mubr.msk.bf16.mxu1 %vm1491_vm0, %v1490_v18 }
 0x658   :  { %v1730_v14 = vpop.f32.mrf.mxu0 }
 0x65a   :  { %v1334_v15 = vpop.f32.mrf.mxu0 }
 0x65c   :  { %v778_v16 = vpop.f32.mrf.mxu0 }
 0x65e   :  { %v1335_v17 = vpop.f32.mrf.mxu0 }
 0x660   :  { %v1732_v19 = vpop.f32.mrf.mxu1  ;;  %v877_v21 = vpop.f32.mrf.mxu0 }
 0x661   :  { %v933_v22 = vsel %vm275_vm3, %v877_v21, -inf }
 0x662   :  { %934 = vmax.xlane.f32.xlu1 %v933_v22  ;;  %v1340_v25 = vpop.f32.mrf.mxu1  ;;  %v1346_v26 = vpop.f32.mrf.mxu0 }
 0x664   :  { %v826_v28 = vpop.f32.mrf.mxu1  ;;  %v880_v29 = vpop.f32.mrf.mxu0 }
 0x666   :  { %v1341_v30 = vpop.f32.mrf.mxu1  ;;  %v1347_v32 = vpop.f32.mrf.mxu0 }
 0x668   :  { %v927_v33 = vpop.f32.mrf.mxu1 }
 0x669   :  { %v936_v34 = vsel %vm275_vm3, %v927_v33, -inf }
 0x66a   :  { %937 = vmax.xlane.f32.xlu0 %v936_v34  ;;  %v1352_v35 = vpop.f32.mrf.mxu1 }
 0x66c   :  { %v930_v36 = vpop.f32.mrf.mxu1 }
 0x66e   :  { %v1353_v38 = vpop.f32.mrf.mxu1 }
 0x673   :  { %1001 = vrot.lane.b32.xlu1 %v1621_v52, %s1498_s27 }
 0x680   :  { %953 = vrot.lane.b32.xlu0 %v1596_v24, %s1498_s27 }
 0x697   :  { %506 = vadd.xlane.f32.xlu1 %v505_v39 }
 0x69b   :  { %729 = vadd.xlane.f32.xlu1 %v728_v40 }
 0x69f   :  { %509 = vadd.xlane.f32.xlu0 %v508_v42 }
 0x6a3   :  { %726 = vadd.xlane.f32.xlu0 %v725_v43 }
 0x6eb   :  { %v935_v44 = vpop.xlane.xlu1 %934 }
 0x6ec   :  { %v939_v45 = vsub.f32 %v877_v21, %v935_v44 }
 0x6ee   :  { %v941_v52 = vmul.f32 1.442695, %v939_v45 }
 0x6ef   :  { %v1002_v46 = vpop.permute.xlu1 %1001 }
 0x6f0   :  { %1447 = vpow2.f32 %v941_v52  ;;  %v1007_v24 = vsel %vm299_vm2, %v1002_v46, 0 }
 0x6f1   :  { %1361 = vmatpush3.bf16.msra.mxu1 %v1007_v24 }
 0x6f3   :  { %v938_v27 = vpop.xlane.xlu0 %937 }
 0x6f4   :  { %v940_v47 = vsub.f32 %v927_v33, %v938_v27 }
 0x6f6   :  { %v943_v48 = vmul.f32 1.442695, %v940_v47 }
 0x6f7   :  { %v954_v49 = vpop.permute.xlu0 %953 }
 0x6f8   :  { %1449 = vpow2.f32 %v943_v48  ;;  %v959_v50 = vsel %vm299_vm2, %v954_v49, 0 }
 0x6f9   :  { %1355 = vmatpush3.bf16.msra.mxu0 %v959_v50 }
 0x6fa   :  { %1366 = vmatprep.subr.bf16.mxu0 %v1490_v18 }
 0x6fd   :  { %v1448_v31 = vpop.eup %1447 }
 0x6fe   :  { %v945_v51 = vsel %vm275_vm3, %v1448_v31, 0.0  ;;  %v951_v54 = vpack.c.bf16 %v1448_v31, %v1448_v31 }
 0x6ff   :  { %946 = vadd.xlane.f32.xlu0 %v945_v51  ;;  %v1096_v51 = vlaneseq }
 0x700   :  { %1357 = vmatmul.mubr.msk.bf16.vlgmr.msra.gmra.mxu0 %vm275_vm3, %v951_v54 }
 0x701   :  { %1374 = vmatprep.mubr.msk.bf16.mxu0 %vm1491_vm0, %v1490_v18  ;;  %1367 = vmatpush3.bf16.msra.mxu0 %v1431_v9 }
 0x702   :  { %1368 = vmatprep.subr.bf16.mxu0 %v1490_v18 }
 0x703   :  { %289 = vadd.xlane.f32.xlu0 %v288_v55 }
 0x705   :  { %v1450_v57 = vpop.eup %1449 }
 0x706   :  { %v948_v58 = vsel %vm275_vm3, %v1450_v57, 0.0  ;;  %v952_v59 = vpack.c.bf16 %v1450_v57, %v1450_v57 }
 0x707   :  { %949 = vadd.xlane.f32.xlu1 %v948_v58 }
 0x708   :  { %1363 = vmatmul.mubr.msk.bf16.vlgmr.msra.gmra.mxu1 %vm275_vm3, %v952_v59 }
 0x70b   :  { %292 = vadd.xlane.f32.xlu1 %v291_v60 }
 0x720   :  { %v507_v62 = vpop.xlane.xlu1 %506 }
 0x721   :  { %1451 = vrcp.f32 %v507_v62 }
 0x724   :  { %v730_v63 = vpop.xlane.xlu1 %729 }
 0x728   :  { %v510_v20 = vpop.xlane.xlu0 %509 }
 0x729   :  { %1453 = vrcp.f32 %v510_v20 }
 0x72a   :  { %1455 = vrcp.f32 %v730_v63 }
 0x72c   :  { %v727_v0 = vpop.xlane.xlu0 %726 }
 0x72d   :  { %1457 = vrcp.f32 %v727_v0 }
 0x72e   :  { %v1452_v53 = vpop.eup %1451 }
 0x72f   :  { %v611_v3 = vmul.f32 %v1452_v53, %v1692_v37  ;;  %v1432_v37 = vld [vmem:[%s1793_s2 + $0x10] sm:$0xff]  }
 0x730   :  { %1369 = vmatpush3.bf16.msra.mxu0 %v1432_v37 }
 0x731   :  { %1370 = vmatprep.subr.bf16.mxu0 %v1490_v18 }
 0x736   :  { %v1454_v2 = vpop.eup %1453 }
 0x737   :  { %v612_v4 = vmul.f32 %v1454_v2, %v1694_v41  ;;  %v1456_v23 = vpop.eup %1455  ;;  %v1433_v41 = vld [vmem:[%s1793_s2 + $0x8] sm:$0xff]  }
 0x738   :  { %v832_v7 = vmul.f32 %v1456_v23, %v1732_v19  ;;  %1371 = vmatpush3.bf16.msra.mxu0 %v1433_v41 }
 0x739   :  { %v1391_v5 = vpack.i.bf16 %v612_v4, %v611_v3  ;;  %1372 = vmatprep.subr.bf16.mxu0 %v1490_v18 }
 0x73a   :  { %v1458_v6 = vpop.eup %1457 }
 0x73b   :  { %1392 = vrot.lane.b32.xlu0 %v1391_v5, %s1497_s26  ;;  %v831_v56 = vmul.f32 %v1458_v6, %v1730_v14 }
 0x73c   :  { %1373 = vmatpush3.bf16.msra.mxu0 %v1434_v13 }
 0x73d   :  { %v1396_v8 = vpack.i.bf16 %v832_v7, %v831_v56 }
 0x73f   :  { %1397 = vrot.lane.b32.xlu1 %v1396_v8, %s1495_s24 }
 0x788   :  { %v947_v10 = vpop.xlane.xlu0 %946 }
 0x789   :  { %1459 = vrcp.f32 %v947_v10 }
 0x78c   :  { %v290_v30 = vpop.xlane.xlu0 %289 }
 0x790   :  { %v950_v11 = vpop.xlane.xlu1 %949 }
 0x791   :  { %1461 = vrcp.f32 %v950_v11 }
 0x792   :  { %1463 = vrcp.f32 %v290_v30 }
 0x794   :  { %v293_v32 = vpop.xlane.xlu1 %292 }
 0x795   :  { %1465 = vrcp.f32 %v293_v32 }
 0x796   :  { %v1460_v17 = vpop.eup %1459 }
 0x79e   :  { %v1462_v19 = vpop.eup %1461 }
 0x79f   :  { %v1464_v34 = vpop.eup %1463 }
 0x7a0   :  { %v391_v43 = vmul.f32 %v1464_v34, %v1650_v61  ;;  %v1097_v61 = vshrl.u32 %v1096_v51, 7 }
 0x7a2   :  { %v1466_v36 = vpop.eup %1465  ;;  %v1098_v55 = vsub.s32 0, %v1097_v61 }
 0x7a3   :  { %v392_v44 = vmul.f32 %v1466_v36, %v1652_v1  ;;  %v1094_v1 = vld [vmem:[%s1794_s3] sm:$0x1] }
 0x7a4   :  { %v1095_v54 = vunpack.c.l.bf16 %v1094_v1 }
 0x7a6   :  { %v1099_v57 = vrot.slane %v1095_v54, %v1098_v55 }
 0x7ad   :  { %v1393_v33 = vpop.permute.xlu0 %1392 }
 0x7ae   :  { %v1395_v38 = vunpack.i.h.bf16 %v1393_v33  ;;  %v1394_v39 = vunpack.i.l.bf16 %v1393_v33 }
 0x7b0   :  { %v1078_v52 = vsel %vm180_vm1, %v392_v44, %v1395_v38  ;;  %v1077_v46 = vsel %vm180_vm1, %v391_v43, %v1394_v39 }
 0x7b1   :  { %v1398_v35 = vpop.permute.xlu1 %1397 }
 0x7b2   :  { %v1400_v40 = vunpack.i.h.bf16 %v1398_v35  ;;  %v1399_v42 = vunpack.i.l.bf16 %v1398_v35 }
 0x7b4   :  { %v1080_v47 = vsel %vm1079_vm4, %v1077_v46, %v1399_v42  ;;  %v1081_v48 = vsel %vm1079_vm4, %v1078_v52, %v1400_v40 }
 0x7c0   :  { %v995_v12 = vpop.f32.mrf.mxu0 }
 0x7c1   :  { %v1051_v22 = vmul.f32 %v1460_v17, %v995_v12 }
 0x7c2   :  { %v1358_v14 = vpop.f32.mrf.mxu0 }
 0x7c4   :  { %v998_v15 = vpop.f32.mrf.mxu0 }
 0x7c6   :  { %v1359_v16 = vpop.f32.mrf.mxu0 }
 0x7c8   :  { %v1043_v21 = vpop.f32.mrf.mxu1 }
 0x7c9   :  { %v1052_v25 = vmul.f32 %v1462_v19, %v1043_v21 }
 0x7ca   :  { %v1364_v26 = vpop.f32.mrf.mxu1 }
 0x7cb   :  { %v1401_v18 = vpack.i.bf16 %v1052_v25, %v1051_v22 }
 0x7cc   :  { %v1046_v28 = vpop.f32.mrf.mxu1 }
 0x7cd   :  { %1402 = vrot.lane.b32.xlu1 %v1401_v18, %s1493_s0 }
 0x7ce   :  { %v1365_v29 = vpop.f32.mrf.mxu1 }
 0x83f   :  { %v1403_v45 = vpop.permute.xlu1 %1402 }
 0x840   :  { %v1405_v24 = vunpack.i.h.bf16 %v1403_v45  ;;  %v1404_v27 = vunpack.i.l.bf16 %v1403_v45 }
 0x842   :  { %v1084_v49 = vsel %vm1082_vm5, %v1081_v48, %v1405_v24  ;;  %v1083_v50 = vsel %vm1082_vm5, %v1080_v47, %v1404_v27 }
 0x843   :  { %v1085_v31 = vpack.c.bf16 %v1084_v49, %v1083_v50 }
 0x845   :  { %1375 = vmatmul.mubr.msk.bf16.vlgmr.msra.gmra.mxu0 %vm1124_vm6, %v1085_v31 }
 0x905   :  { %v1162_v58 = vpop.f32.mrf.mxu0 }
 0x906   :  { %v1163_v59 = vadd.f32 %v1162_v58, %v1099_v57 }
 0x907   :  { %v1376_v60 = vpop.f32.mrf.mxu0 }
 0x908   :  { %1169 = vst [vmem:[#allocation2] sm:$0xff] %v1163_v59 }
 0x909   :  { %v1165_v62 = vpop.f32.mrf.mxu0 }
 0x90a   :  { %v1166_v63 = vadd.f32 %v1165_v62, %v1099_v57 }
 0x90b   :  { %v1377_v20 = vpop.f32.mrf.mxu0 }
 0x90c   :  { %1170 = vst [vmem:[#allocation2 + $0x8] sm:$0xff] %v1166_v63 }
 0x90d   :  { %1478 = shalt.err (!%p1475_p4)
}
 0x90e   :  { %s1500_s3 = smov 128   ;;  %s1501_s14 = smov 8  }
 0x90f   :  { %1182 = dma.vmem_to_hbm [thread:$0]  %s1177_s12, 256, %s1795_s4, [#allocation3], %s1500_s3, %s1500_s3, %s1501_s14  }
 0x910   :  { %1487 = dma.done.wait [#allocation3], 256  }
 0x911   :  { %1488 = vsyncadd [#allocation3], 4294967040 }
 0x912   :  { %1186 = vsyncpa [#allocation3], 1 }

</bundles_post_ra>
